<compile_context>
chip_gen: v7x
topology: tpu7x:2x2x1
jax: 0.10.0
libtpu: 0.0.40
codegen_flags: <defaults>
</compile_context>

<pallas_src>
import functools
from typing import NamedTuple

import jax
import jax.numpy as jnp
from jax import lax
from jax.experimental import pallas as pl
from jax.experimental.pallas import tpu as pltpu


# ---------------------------------------------------------------------------
# Tiling / VMEM helpers
# ---------------------------------------------------------------------------
def _round_up(x, m):
    return ((x + m - 1) // m) * m


def _choose_tiling(N, *, ti_max=1024, tk_max=256):
    """Pick (Np, ti, tk): ti is a multiple of tk, Np a multiple of ti."""
    n128 = _round_up(N, 128)
    tk = 128
    while tk * 2 <= tk_max and tk * 2 <= n128:
        tk *= 2
    ti = tk
    # Keep >= 2 row blocks when possible so the "parallel" row axis still
    # splits across v7x's two TensorCores (and megacore on v5e/v6e).
    while ti * 2 <= ti_max and _round_up(N, ti * 2) // (ti * 2) >= 2:
        ti *= 2
    return _round_up(N, ti), ti, tk


def _vmem_limit_bytes(Np, D, ti, tk, resident, out_itemsize):
    """Explicit scoped-VMEM limit: what the pipeline needs, capped for v7x."""
    adj_b = 2 * ti * tk * 2                                    # dbl-buffered bf16 adj tile
    side_b = (2 * Np * D * 2) if resident else (2 * tk * D * 2)  # emb / t operand
    out_b = 2 * ti * D * out_itemsize
    acc_b = ti * D * 4
    need = adj_b + side_b + out_b + acc_b
    # Generous headroom, capped at 48 MiB so the same config fits v7x (64 MiB
    # physical VMEM); v5e/v6e have 128 MiB so the cap is always safe there.
    return int(min(48 << 20, max(2 * need + (4 << 20), 16 << 20)))


# VMEM-resident emb/t threshold: keep two copies of (Np, D) bf16 under ~8 MiB.
_RESIDENT_BUDGET_BYTES = 8 << 20


# ---------------------------------------------------------------------------
# Pass 1:  t[i_blk] = sum_k  adj[k_blk, i_blk]^T @ emb[k_blk]
# ---------------------------------------------------------------------------
def _pass1_kernel(adj_ref, emb_ref, t_ref, acc_ref, *, tk, resident):
    k = pl.program_id(1)
    if resident:
        start = pl.multiple_of(k * tk, tk)
        emb_blk = emb_ref[pl.ds(start, tk), :]     # whole emb lives in VMEM
    else:
        emb_blk = emb_ref[...]                     # streamed (tk, D) block

    # Contract dim 0 of both operands: (tk, ti)^T @ (tk, D) -> (ti, D).
    # Transposed-LHS contraction stays on the MXU data path (no VMEM/XLU tile
    # transpose); if the lowering ever inserts one, materialize adj.T in HBM.
    part = lax.dot_general(
        adj_ref[...], emb_blk,
        dimension_numbers=(((0,), (0,)), ((), ())),
        preferred_element_type=jnp.float32,
    )

    @pl.when(k == 0)
    def _():
        acc_ref[...] = part                        # direct store, no zero-fill

    @pl.when(k != 0)
    def _():
        acc_ref[...] += part

    @pl.when(k == pl.num_programs(1) - 1)
    def _():
        t_ref[...] = acc_ref[...].astype(t_ref.dtype)


# ---------------------------------------------------------------------------
# Pass 2:  y[i_blk] = leaky_relu( sum_k  adj[i_blk, k_blk] @ t[k_blk] )
# ---------------------------------------------------------------------------
def _pass2_kernel(adj_ref, t_ref, out_ref, acc_ref, *, tk, resident, leaky, act):
    k = pl.program_id(1)
    if resident:
        start = pl.multiple_of(k * tk, tk)
        t_blk = t_ref[pl.ds(start, tk), :]
    else:
        t_blk = t_ref[...]

    part = jnp.dot(adj_ref[...], t_blk, preferred_element_type=jnp.float32)

    @pl.when(k == 0)
    def _():
        acc_ref[...] = part

    @pl.when(k != 0)
    def _():
        acc_ref[...] += part

    @pl.when(k == pl.num_programs(1) - 1)
    def _():
        y = acc_ref[...]                           # f32
        if act:
            y = jnp.where(y >= 0, y, leaky * y)    # fused LeakyReLU epilogue
        out_ref[...] = y.astype(out_ref.dtype)


# ---------------------------------------------------------------------------
# Tiled wrappers
# ---------------------------------------------------------------------------
def _tiled_pass1(adj, emb, *, ti, tk, resident):
    Np, D = emb.shape
    grid = (Np // ti, Np // tk)
    if resident:
        emb_spec = pl.BlockSpec((Np, D), lambda i, k: (0, 0))   # fetched once
    else:
        emb_spec = pl.BlockSpec((tk, D), lambda i, k: (k, 0))
    return pl.pallas_call(
        functools.partial(_pass1_kernel, tk=tk, resident=resident),
        out_shape=jax.ShapeDtypeStruct((Np, D), emb.dtype),
        grid_spec=pltpu.PrefetchScalarGridSpec(
            num_scalar_prefetch=0,
            grid=grid,
            in_specs=[
                # adj block at (block-row k, block-col i): contributes to t row-block i
                pl.BlockSpec((tk, ti), lambda i, k: (k, i)),
                emb_spec,
            ],
            out_specs=pl.BlockSpec((ti, D), lambda i, k: (i, 0)),
            scratch_shapes=[pltpu.VMEM((ti, D), jnp.float32)],
        ),
        compiler_params=pltpu.CompilerParams(
            dimension_semantics=("parallel", "arbitrary"),
            vmem_limit_bytes=_vmem_limit_bytes(
                Np, D, ti, tk, resident, jnp.dtype(emb.dtype).itemsize),
        ),
    )(adj, emb)


def _tiled_pass2(adj, t, *, ti, tk, resident, leaky, act, out_dtype):
    Np, D = t.shape
    grid = (Np // ti, Np // tk)
    if resident:
        t_spec = pl.BlockSpec((Np, D), lambda i, k: (0, 0))
    else:
        t_spec = pl.BlockSpec((tk, D), lambda i, k: (k, 0))
    kernel = functools.partial(_pass2_kernel, tk=tk, resident=resident,
                               leaky=leaky, act=act)
    return pl.pallas_call(
        kernel,
        out_shape=jax.ShapeDtypeStruct((Np, D), out_dtype),
        grid_spec=pltpu.PrefetchScalarGridSpec(
            num_scalar_prefetch=0,
            grid=grid,
            in_specs=[
                # adj block at (block-row i, block-col k)
                pl.BlockSpec((ti, tk), lambda i, k: (i, k)),
                t_spec,
            ],
            out_specs=pl.BlockSpec((ti, D), lambda i, k: (i, 0)),
            scratch_shapes=[pltpu.VMEM((ti, D), jnp.float32)],
        ),
        compiler_params=pltpu.CompilerParams(
            dimension_semantics=("parallel", "arbitrary"),
            vmem_limit_bytes=_vmem_limit_bytes(
                Np, D, ti, tk, resident, jnp.dtype(out_dtype).itemsize),
        ),
    )(adj, t)


def hgcn_conv(adj_bf16, emb_bf16, *, ti, tk, resident, leaky=0.5, act=True,
              out_dtype=jnp.bfloat16):
    """One HGCNConv layer: leaky_relu(adj @ (adj.T @ emb)), two tiled passes."""
    t = _tiled_pass1(adj_bf16, emb_bf16, ti=ti, tk=tk, resident=resident)
    return _tiled_pass2(adj_bf16, t, ti=ti, tk=tk, resident=resident,
                        leaky=leaky, act=act, out_dtype=out_dtype)


# ---------------------------------------------------------------------------
# Module-level forward
# ---------------------------------------------------------------------------
class PreparedAdjacency(NamedTuple):
    adj: jax.Array   # (Np, Np) bf16, zero-padded
    n: int           # original N
    n_padded: int
    ti: int
    tk: int


def prepare_adjacency(sparse_norm_adj, *, ti_max=1024, tk_max=256):
    """Pad + bf16-cast the (static) normalized adjacency ONCE.

    The adjacency does not change between forward calls, so the O(N^2)
    pad/cast HBM pass is done here once and the result reused for every call.
    Zero padding is numerically exact (zero rows/cols are inert).
    """
    N = sparse_norm_adj.shape[0]
    Np, ti, tk = _choose_tiling(N, ti_max=ti_max, tk_max=tk_max)
    pad = Np - N
    adj = jnp.pad(sparse_norm_adj.astype(jnp.bfloat16), ((0, pad), (0, pad)))
    return PreparedAdjacency(adj, N, Np, ti, tk)


def group_aware_encoder_forward(ego_embeddings, prepared, *, n_users, layers,
                                prefer_resident=True):
    """Reproduces GroupAwareEncoder.forward (intended semantics).

    ego_embeddings : (N, D) f32, N = n_users + n_items
    prepared       : PreparedAdjacency from prepare_adjacency(...)
    """
    adj, N, Np, ti, tk = prepared
    D = ego_embeddings.shape[1]
    assert D % 128 == 0, "embedding dim must be lane-aligned (multiple of 128)"

    # Keep emb / t fully VMEM-resident when two bf16 copies fit a small budget.
    resident = prefer_resident and (2 * Np * D * 2 <= _RESIDENT_BUDGET_BYTES)

    ego = jnp.pad(ego_embeddings.astype(jnp.bfloat16), ((0, Np - N), (0, 0)))
    for layer in range(layers):
        last = layer == layers - 1
        out_dtype = ego_embeddings.dtype if last else jnp.bfloat16
        ego = hgcn_conv(adj, ego, ti=ti, tk=tk, resident=resident,
                        leaky=0.5, act=True, out_dtype=out_dtype)

    final = ego[:N]
    return final[:n_users], final[n_users:]


# ---------------------------------------------------------------------------
# Demo / self-check
# ---------------------------------------------------------------------------
if __name__ == "__main__":
    # Small deterministic problem that still exercises the real tiling:
    # N = 600 -> Np = 768, rectangular tiles ti=256 / tk=128 -> grid (3, 6).
    n_users, n_items = 280, 320
    N = n_users + n_items
    D = 128
    layers = 2

    key = jax.random.PRNGKey(0)
    k_emb, k_adj = jax.random.split(key)

    ego_embeddings = jax.random.normal(k_emb, (N, D), dtype=jnp.float32)

    # Deterministic synthetic normalized adjacency (dense stand-in for the
    # torch.sparse norm_adj): sparse-ish nonneg matrix, symmetric-ish norm.
    raw = jax.random.uniform(k_adj, (N, N), dtype=jnp.float32)
    mask = (raw > 0.7).astype(jnp.float32)
    adjm = raw * mask
    row_sum = jnp.maximum(adjm.sum(axis=1, keepdims=True), 1e-6)
    sparse_norm_adj = adjm / jnp.sqrt(row_sum) / jnp.sqrt(row_sum.T)

    # Prepared once, reused for every forward call (and both modes below).
    prepared = prepare_adjacency(sparse_norm_adj, ti_max=256, tk_max=128)

    # ---- references -------------------------------------------------------
    def leaky_relu(x, s=0.5):
        return jnp.where(x >= 0, x, s * x)

    # (a) bf16-emulated reference mirroring the kernel's precision pipeline.
    a16 = sparse_norm_adj.astype(jnp.bfloat16).astype(jnp.float32)
    x = ego_embeddings.astype(jnp.bfloat16).astype(jnp.float32)
    for k in range(layers):
        t = (a16.T @ x).astype(jnp.bfloat16).astype(jnp.float32)
        y = leaky_relu(a16 @ t)
        x = y if k == layers - 1 else y.astype(jnp.bfloat16).astype(jnp.float32)
    ref_bf16 = x

    # (b) pure f32 reference of the original module semantics.
    ref_f32 = ego_embeddings
    for _ in range(layers):
        ref_f32 = leaky_relu(sparse_norm_adj @ (sparse_norm_adj.T @ ref_f32))

    # Exercise both operand-residency modes (VMEM-resident emb/t and streamed).
    for prefer_resident in (True, False):
        user_emb, item_emb = group_aware_encoder_forward(
            ego_embeddings, prepared, n_users=n_users, layers=layers,
            prefer_resident=prefer_resident)
        user_emb = jax.block_until_ready(user_emb)
        item_emb = jax.block_until_ready(item_emb)

        assert user_emb.shape == (n_users, D)
        assert item_emb.shape == (n_items, D)
        assert jnp.allclose(user_emb, ref_bf16[:n_users], atol=1e-3, rtol=1e-2), \
            f"mismatch vs bf16-emulated reference (users, resident={prefer_resident})"
        assert jnp.allclose(item_emb, ref_bf16[n_users:], atol=1e-3, rtol=1e-2), \
            f"mismatch vs bf16-emulated reference (items, resident={prefer_resident})"
        # Loose check against the exact f32 semantics (bf16 adjacency rounding).
        assert jnp.allclose(user_emb, ref_f32[:n_users], atol=2e-2, rtol=1e-1)
        assert jnp.allclose(item_emb, ref_f32[n_users:], atol=2e-2, rtol=1e-1)

    print("KERNEL_OK")
</pallas_src>

<mosaic_0001>
module attributes {stable_mosaic.version = 11 : i64} {
  func.func @_pass1_kernel(%arg0: i32, %arg1: i32, %arg2: memref<128x256xbf16, #tpu.memory_space<vmem>>, %arg3: memref<768x128xbf16, #tpu.memory_space<vmem>>, %arg4: memref<256x128xbf16, #tpu.memory_space<vmem>>, %arg5: memref<256x128xf32, #tpu.memory_space<vmem>>) attributes {dimension_semantics = [#tpu.dimension_semantics<parallel>, #tpu.dimension_semantics<arbitrary>], iteration_bounds = array<i64: 3, 6>, scalar_prefetch = 0 : i64, scratch_operands = 1 : i64, tpu.core_type = #tpu.core_type<tc>, window_params = [{transform_indices = @transform_0, window_bounds = array<i64: 128, 256>}, {pipeline_mode = #tpu.pipeline_mode<synchronous>, transform_indices = @transform_1, window_bounds = array<i64: 768, 128>}, {transform_indices = @transform_2, window_bounds = array<i64: 256, 128>}]} {
    %c128_i32 = arith.constant 128 : i32
    %0 = arith.muli %arg1, %c128_i32 : i32
    %1 = tpu.assume_multiple %0, 128 : i32
    %2 = arith.index_cast %1 : i32 to index
    %c0 = arith.constant 0 : index
    %3 = vector.load %arg3[%2, %c0] : memref<768x128xbf16, #tpu.memory_space<vmem>>, vector<128x128xbf16>
    %c0_0 = arith.constant 0 : index
    %c0_1 = arith.constant 0 : index
    %4 = vector.load %arg2[%c0_0, %c0_1] : memref<128x256xbf16, #tpu.memory_space<vmem>>, vector<128x256xbf16>
    %cst = arith.constant dense<0.000000e+00> : vector<256x128xf32>
    %5 = tpu.matmul %4, %3, %cst {dimension_numbers = #tpu.dot_dimension_numbers<[0], [0], [1], [1], [0, 1, 1, 1], [], []>} : vector<128x256xbf16>, vector<128x128xbf16>, vector<256x128xf32> -> vector<256x128xf32>
    %c0_i32 = arith.constant 0 : i32
    %6 = arith.cmpi eq, %arg1, %c0_i32 : i32
    %7 = arith.extui %6 : i1 to i32
    %c0_i32_2 = arith.constant 0 : i32
    %8 = arith.cmpi ne, %7, %c0_i32_2 : i32
    scf.if %8 {
      %c0_6 = arith.constant 0 : index
      %c0_7 = arith.constant 0 : index
      %15 = vector.load %arg5[%c0_6, %c0_7] : memref<256x128xf32, #tpu.memory_space<vmem>>, vector<256x128xf32>
      tpu.vector_store %arg5[%c0_6, %c0_7], %5 {strides = array<i32>} : memref<256x128xf32, #tpu.memory_space<vmem>>, vector<256x128xf32>,
    } else {
    }
    %c0_i32_3 = arith.constant 0 : i32
    %9 = arith.cmpi ne, %arg1, %c0_i32_3 : i32
    %10 = arith.extui %9 : i1 to i32
    %c0_i32_4 = arith.constant 0 : i32
    %11 = arith.cmpi ne, %10, %c0_i32_4 : i32
    scf.if %11 {
      %c0_6 = arith.constant 0 : index
      %c0_7 = arith.constant 0 : index
      %15 = vector.load %arg5[%c0_6, %c0_7] : memref<256x128xf32, #tpu.memory_space<vmem>>, vector<256x128xf32>
      %16 = arith.addf %15, %5 : vector<256x128xf32>
      %c0_8 = arith.constant 0 : index
      %c0_9 = arith.constant 0 : index
      %17 = vector.load %arg5[%c0_8, %c0_9] : memref<256x128xf32, #tpu.memory_space<vmem>>, vector<256x128xf32>
      tpu.vector_store %arg5[%c0_8, %c0_9], %16 {strides = array<i32>} : memref<256x128xf32, #tpu.memory_space<vmem>>, vector<256x128xf32>,
    } else {
    }
    %c5_i32 = arith.constant 5 : i32
    %12 = arith.cmpi eq, %arg1, %c5_i32 : i32
    %13 = arith.extui %12 : i1 to i32
    %c0_i32_5 = arith.constant 0 : i32
    %14 = arith.cmpi ne, %13, %c0_i32_5 : i32
    scf.if %14 {
      %c0_6 = arith.constant 0 : index
      %c0_7 = arith.constant 0 : index
      %15 = vector.load %arg5[%c0_6, %c0_7] : memref<256x128xf32, #tpu.memory_space<vmem>>, vector<256x128xf32>
      %16 = arith.truncf %15 : vector<256x128xf32> to vector<256x128xbf16>
      %c0_8 = arith.constant 0 : index
      %c0_9 = arith.constant 0 : index
      %17 = vector.load %arg4[%c0_8, %c0_9] : memref<256x128xbf16, #tpu.memory_space<vmem>>, vector<256x128xbf16>
      tpu.vector_store %arg4[%c0_8, %c0_9], %16 {strides = array<i32>} : memref<256x128xbf16, #tpu.memory_space<vmem>>, vector<256x128xbf16>,
    } else {
    }
    return
  }
  func.func @transform_0(%arg0: i32, %arg1: i32) -> (i32, i32) {
    %c0_i32 = arith.constant 0 : i32
    return %arg1, %arg0 : i32, i32
  }
  func.func @transform_1(%arg0: i32, %arg1: i32) -> (i32, i32) {
    %c0_i32 = arith.constant 0 : i32
    %c0_i32_0 = arith.constant 0 : i32
    %c0_i32_1 = arith.constant 0 : i32
    return %c0_i32, %c0_i32_0 : i32, i32
  }
  func.func @transform_2(%arg0: i32, %arg1: i32) -> (i32, i32) {
    %c0_i32 = arith.constant 0 : i32
    %c0_i32_0 = arith.constant 0 : i32
    return %arg0, %c0_i32 : i32, i32
  }
}

</mosaic_0001>

<bundles_post_ra>
// kernel: tpu_custom_call.1
= control target key start
LH: loop header
LB: loop body
LE: loop exit
PB: predicated region body
PF: predicated region fallthrough
CT: control target
= control target key end

     0   :  { %s2111_s0 = inlined_call_operand.hbm [shape: bf16[768,768], index: 0, kind: input, shape index: {}]   ;;  %s2112_s1 = inlined_call_operand.hbm [shape: bf16[768,128], index: 1, kind: input, shape index: {}]   ;;  %s2113_s2 = inlined_call_operand.hbm [shape: bf16[768,128], index: 2, kind: output, shape index: {}]  }
   0x1   :  { %2124 = sst [smem:[#allocation16_spill]] %s2112_s1 }
   0x2   :  { %7 = vsyncpa [#allocation4], 0 }
   0x3   :  { %9 = vsyncpa [#allocation4 + $0x1], 0 }
   0x4   :  { %10 = vsyncpa [#allocation7], 0 }
   0x5   :  { %11 = vsyncpa [#allocation5], 0 }
   0x6   :  { %13 = vsyncpa [#allocation5 + $0x1], 0  ;;  %s1661_s9 = smov 0   ;;  %s1663_s10 = smov 0  }
   0x7   :  { %s1665_s11 = smov 0   ;;  %s1667_s12 = smov 0  }
   0x8   :  { %s1669_s13 = smov 0   ;;  %s1671_s14 = smov 0  }
   0x9   :  { %s1673_s15 = smov 0   ;;  %s1675_s16 = smov 0  }
   0xa   :  { %s1677_s17 = smov 0   ;;  %s1679_s18 = smov 0  }
   0xb   :  { %s1681_s19 = smov 0  }
   0xc LB: > { %2125 = sst [smem:[#allocation12_spill]] %s1594_s9  ;;  %s1001_s20 = sadd.s32 4294967295, %s1634_s19   ;;  %s1634_s19 = sphi %s1681_s19, %s19_s19   ;;  %s1630_s18 = sphi %s1679_s18, %s2159_s18   ;;  %s1626_s17 = sphi %s1677_s17, %s2158_s17   ;;  %s1622_s16 = sphi %s1675_s16, %s2157_s16   ;;  %s1618_s15 = sphi %s1673_s15, %s2156_s15   ;;  %s1614_s14 = sphi %s1671_s14, %s2155_s14   ;;  %s1610_s13 = sphi %s1669_s13, %s2154_s13   ;;  %s1606_s12 = sphi %s1667_s12, %s2153_s12   ;;  %s1602_s11 = sphi %s1665_s11, %s2152_s11   ;;  %s1598_s10 = sphi %s1663_s10, %s2151_s10   ;;  %s1594_s9 = sphi %s1661_s9, %s2150_s9  }
   0xd   : > { %s1002_s21 = sadd.s32 4294967294, %s1634_s19   ;;  %p47_p0 = scmp.ne.s32.totalorder %s1614_s14, %s1610_s13 }
   0xe   : > { %p48_p1 = scmp.eq.s32.totalorder %s1634_s19, 0  ;;  %p53_p2 = scmp.ne.s32.totalorder %s1610_s13, %s1606_s12 }
   0xf   : > { %p1721_p3 = scmp.eq.s32.totalorder %s1001_s20, 0  ;;  %p97_p5 = scmp.ne.s32.totalorder %s1602_s11, %s1598_s10 }
  0x10   : > { %p1726_p4 = por %p48_p1, %p47_p0  ;;  %p98_p7 = scmp.eq.s32.totalorder %s1001_s20, 17 }
  0x11   : > { %s2126_s23 = scalar_select %p1721_p3, 1, 0 }
  0x12   : > { %p1734_p6 = por %p1721_p3, %p53_p2  ;;  %p103_p8 = scmp.ne.s32.totalorder %s1598_s10, %s1594_s9 }
  0x13   : > { %p104_p9 = scmp.eq.s32.totalorder %s1002_s21, 17  ;;  %p1740_p10 = por %p98_p7, %p97_p5 }
  0x14   : > { %s2128_s26 = scalar_select %p1734_p6, 1, 0 }
  0x15   : > { %s2129_s27 = scalar_select %p1740_p10, 1, 0 }
  0x16   : > { %p1003_p11 = scmp.ge.s32.totalorder %s1634_s19, 1  ;;  %p1745_p12 = por %p104_p9, %p103_p8 }
  0x17   : > { %p111_p13 = scmp.lt.s32.totalorder %s1634_s19, 19  ;;  %s1636_s30 = smov [#allocation6]  }
  0x18   : > { %s2130_s28 = scalar_select %p1745_p12, 1, 0 }
  0x19   : > { %p1750_p0 = pnand %p1003_p11, %p111_p13  ;;  %s123_s3 = sshll.u32 %s1636_s30, 4  ;;  %s124_s3 = int_to_ptr.vmem [resolvable:$true] %s123_s3 }
  0x1a   : > { %2131 = sst [smem:[#allocation13_spill]] %s2130_s28  ;;  %p1319_p2 = scmp.lt.s32.totalorder %s1634_s19, 18 }
  0x1b   : > { %s2132_s29 = scalar_select %p1750_p0, 1, 0 }
  0x1c   : > { %p1306_p1 = pneg %p1750_p0  ;;  %p1765_p7 = pnand %p1319_p2, %p1726_p4 }
  0x1d   : > { %s2135_s1 = sld [smem:[#allocation16_spill]] }
  0x1e   : > { %p1759_p5 = pnand %p1306_p1, %p1721_p3 }
  0x1f   : > { %s2134_s5 = scalar_select %p1765_p7, 1, 0 }
  0x20   : > { %p1452_p9 = pneg %p1759_p5 }
  0x23   : > { %s1450_s8 = scalar_lea.hbm %s2135_s1, 6144 }
  0x24   : > { %p1451_p8 = scmp.ne.s32.totalorder %s2135_s1, %s1450_s8  ;;  %p1457_p1 = scmp.lt.u32.totalorder %s1450_s8, %s2135_s1 }
  0x26   : > { %p1453_p11 = pnand %p1452_p9, %p1451_p8 }
  0x28   : > { %p1454_p13 = pneg %p1453_p11 }
  0x2a   : > { %p1459_p4 = pnand %p1457_p1, %p1454_p13 }
  0x2c   : > { %1462 = shalt.err (!%p1459_p4)
}
  0x2d   : > { %s1463_s25 = scalar_lea.vmem %s124_s3, 6144  ;;  %p1471_p3 = scmp.lt.s32.totalorder %s124_s3, %s124_s3 }
  0x2e   : > { %p1464_p2 = scmp.ne.s32.totalorder %s124_s3, %s1463_s25  ;;  %p1472_p6 = scmp.lt.s32.totalorder %s1463_s25, %s1463_s25 }
  0x30   : > { %p1466_p12 = pnand %p1464_p2, %p1452_p9  ;;  %p1473_p0 = por %p1472_p6, %p1471_p3 }
  0x32   : > { %p1467_p10 = pneg %p1466_p12 }
  0x34   : > { %p1474_p7 = pnand %p1473_p0, %p1467_p10 }
  0x36   : > { %1477 = shalt.err (!%p1474_p7)
}
  0x37   : > { %s1637_s6 = smov 64   ;;  %s1638_s7 = smov 4  }
  0x38   : > { %1309 = dma.hbm_to_vmem [thread:$0]  (!%p1759_p5), %s2135_s1, 6144, %s124_s3, [#allocation7], %s1637_s6, %s1637_s6, %s1638_s7  }
  0x39   : > { %s28_s20 = sadd.s32 1, %s1626_s17  ;;  %s31_s21 = sadd.s32 1, %s1630_s18 }
  0x3a   : > { %p29_p3 = scmp.ge.s32.totalorder %s28_s20, 6  ;;  %s137_s30 = sand.u32 1, %s1614_s14  }
  0x3b   : > { %s1006_s25 = sshll.u32 %s137_s30, 7  ;;  %s1008_s4 = sshll.u32 %s1630_s18, 1 }
  0x3c   : > { %s2161_s20 = smov (%p29_p3, %s28_s20), 0  ;;  %s2163_s21 = smov (!%p29_p3, %s31_s21), %s1630_s18 }
  0x3d   : > { %2136 = sst [smem:[#allocation14_spill]] %s2161_s20  ;;  %s35_s22 = ssub.s32 %s1626_s17, %s2161_s20 }
  0x3e   : > { %p33_p6 = scmp.ge.s32.totalorder %s2163_s21, 3  ;;  %s1297_s24 = smul.u32 96, %s1626_s17 }
  0x3f   : > { %s141_s8 = scalar_lea.vmem [#allocation3], %s1006_s25  ;;  %s2138_s25 = sadd.s32 1, %s1602_s11 }
  0x40   : > { %s151_s3 = sshll.u32 %s141_s8, 4  ;;  %s2165_s21 = smov (%p33_p6, %s2163_s21), 0  ;;  %s1797_s3 = int_to_ptr.vmem [resolvable:$true] %s151_s3 }
  0x41   : > { %2137 = sst [smem:[#allocation15_spill]] %s2165_s21  ;;  %s148_s6 = sadd.s32 %s1297_s24, %s1008_s4 }
  0x42   : > { %s36_s7 = ssub.s32 %s1630_s18, %s2165_s21  ;;  %s1010_s12 = sshll.u32 %s148_s6, 6 }
  0x43   : > { %s37_s1 = sor.u32 %s36_s7, %s35_s22  ;;  %p85_p10 = scmp.eq.s32.totalorder %s36_s7, 0 }
  0x44   : > { %p38_p12 = scmp.eq.s32.totalorder %s37_s1, 0  ;;  %s1804_s9 = scalar_lea.hbm %s2111_s0, %s1010_s12 }
  0x45   : > { %s1809_s8 = scalar_select %p85_p10, %s1602_s11, %s2138_s25  }
  0x46   : > { %s2139_s24 = sadd.s32 1, %s1614_s14  ;;  %s1816_s21 = scalar_lea.sflag [#allocation4], %s137_s30 }
  0x47   : > { %s1814_s4 = scalar_select %p38_p12, %s1614_s14, %s2139_s24  }
  0x48   : > { %s1478_s22 = scalar_lea.hbm %s1804_s9, 2048  ;;  %p2140_p5 = scmp.ne.s32.totalorder %s2134_s5, 0 }
  0x49   : > { %p1479_p0 = scmp.ne.s32.totalorder %s1804_s9, %s1478_s22  ;;  %s1483_s20 = scalar_lea.hbm %s2111_s0, 36864 }
  0x4a   : > { %p1480_p7 = pneg %p2140_p5  ;;  %p1484_p11 = scmp.lt.u32.totalorder %s1804_s9, %s2111_s0 }
  0x4b   : > { %p1485_p13 = scmp.lt.u32.totalorder %s1483_s20, %s1478_s22  ;;  %p1487_p4 = scmp.lt.u32.totalorder %s1478_s22, %s1804_s9 }
  0x4c   : > { %p1481_p8 = pnand %p1480_p7, %p1479_p0 }
  0x4d   : > { %p1486_p1 = por %p1485_p13, %p1484_p11 }
  0x4e   : > { %p1482_p9 = pneg %p1481_p8 }
  0x4f   : > { %p1488_p2 = por %p1487_p4, %p1486_p1 }
  0x51   : > { %p1489_p3 = pnand %p1488_p2, %p1482_p9 }
  0x53   : > { %1492 = shalt.err (!%p1489_p3)
}
  0x54   : > { %s1493_s30 = scalar_lea.vmem %s1797_s3, 2048  ;;  %s1639_s12 = smov [#allocation3]  }
  0x55   : > { %p1494_p6 = scmp.ne.s32.totalorder %s1797_s3, %s1493_s30  ;;  %s1498_s25 = sshll.u32 %s1639_s12, 4  ;;  %s1499_s25 = int_to_ptr.vmem [resolvable:$false] %s1498_s25 }
  0x56   : > { %s1500_s24 = scalar_lea.vmem %s1499_s25, 4096  ;;  %p1501_p0 = scmp.lt.s32.totalorder %s1797_s3, %s1499_s25 }
  0x57   : > { %p1496_p10 = pnand %p1494_p6, %p1480_p7  ;;  %p1502_p8 = scmp.lt.s32.totalorder %s1500_s24, %s1493_s30 }
  0x59   : > { %p1497_p12 = pneg %p1496_p10  ;;  %p1503_p11 = por %p1502_p8, %p1501_p0 }
  0x5b   : > { %p1504_p13 = pnand %p1503_p11, %p1497_p12 }
  0x5d   : > { %1507 = shalt.err (!%p1504_p13)
}
  0x5e   : > { %s1640_s22 = smov 384   ;;  %s1641_s1 = smov 128  }
  0x5f   : > { %s1642_s28 = smov 8   ;;  %p2141_p7 = scmp.ne.s32.totalorder %s2132_s29, 0 }
  0x60   : > { %1313 = dma.hbm_to_vmem [thread:$0]  (!%p2140_p5), %s1804_s9, 2048, %s1797_s3, %s1816_s21, %s1640_s22, %s1641_s1, %s1642_s28  }
  0x61   : > { %163 = sbr.rel (%p2141_p7) target bundleno = 519 (0x207), region = 28  ;;  %s165_s20 = sand.u32 (!%p2141_p7), 1, %s1610_s13  }
  0x62   : > { %s1012_s6 = sshll.u32 (!%p2141_p7), %s165_s20, 7  ;;  %s166_s7 = scalar_lea.sflag (!%p2141_p7), [#allocation4], %s165_s20 }
  0x63   : > { %s1847_s30 = scalar_lea.vmem (!%p2141_p7), [#allocation3], %s1012_s6  ;;  %p2142_p9 = scmp.ne.s32.totalorder (!%p2141_p7), %s2128_s26, 0 }
  0x68   : > { %1581 = dma.done.wait (%p2142_p9), %s166_s7, 2048  }
  0x69   : > { %1583 = vsyncadd (%p2142_p9), %s166_s7, 4294965248  ;;  %p2143_p1 = scmp.ne.s32.totalorder %s2126_s23, 0 }
  0x6b   : > { %1585 = dma.done.wait (%p2143_p1), [#allocation7], 6144  }
  0x6c   : > { %1587 = vsyncadd (%p2143_p1), [#allocation7], 4294961152  ;;  %s191_s9 = sand.u32 1, %s1598_s10   ;;  %s1015_s29 = sshll.u32 %s1618_s15, 7  ;;  %v1418_v0 = vld [vmem:[%s1847_s30 + $0x4] ss:$8 sps:$4 sm:$0xff]  }
  0x6d   : > { %s1860_s26 = sshll.u32 %s191_s9, 7  ;;  %v1420_v1 = vld [vmem:[%s1847_s30] ss:$8 sps:$4 sm:$0xff]   ;;  %331 = vxpose.xlu1.c.b16.start [1/8] %v1418_v0, 128  ;;  %v1421_v2 = vld [vmem:[%s1847_s30 + $0x14] ss:$8 sps:$4 sm:$0xff]   ;;  %s199_s23 = sshra.s32 %s1015_s29, 3 }
  0x6e   : > { %315 = vxpose.xlu0.c.b16.start [1/8] %v1420_v1, 128  ;;  %v1423_v3 = vld [vmem:[%s1847_s30 + $0x10] ss:$8 sps:$4 sm:$0xff]   ;;  %s1016_s5 = sshll.u32 %s199_s23, 2  ;;  %v1424_v4 = vld [vmem:[%s1847_s30 + $0x24] ss:$8 sps:$4 sm:$0xff]   ;;  %s1954_s3 = scalar_lea.vmem [#allocation8], %s1860_s26 }
  0x6f   : > { %v1426_v5 = vld [vmem:[%s1847_s30 + $0x20] ss:$8 sps:$4 sm:$0xff]   ;;  %v1427_v6 = vld [vmem:[%s1847_s30 + $0x34] ss:$8 sps:$4 sm:$0xff]   ;;  %v1429_v7 = vld [vmem:[%s1847_s30 + $0x30] ss:$8 sps:$4 sm:$0xff]  }
  0x70   : > { %s1871_s21 = scalar_lea.vmem [#allocation6], %s1016_s5  ;;  %v1430_v10 = vld [vmem:[%s1847_s30 + $0x44] ss:$8 sps:$4 sm:$0xff]   ;;  %v1432_v11 = vld [vmem:[%s1847_s30 + $0x40] ss:$8 sps:$4 sm:$0xff]   ;;  %p1041_p5 = scmp.ne.s32.totalorder %s1618_s15, 0 }
  0x71   : > { %332 = vxpose.xlu1.c.b16.cont [2/8] %v1421_v2, 128  ;;  %v1442_v8 = vld [vmem:[%s1871_s21] sm:$0xff]   ;;  %v1443_v9 = vld [vmem:[%s1871_s21 + $0x8] sm:$0xff]   ;;  %v1444_v12 = vld [vmem:[%s1871_s21 + $0x10] sm:$0xff]  }
  0x72   : > { %316 = vxpose.xlu0.c.b16.cont [2/8] %v1423_v3, 128  ;;  %1233 = vmatprep.subr.bf16.mxu0 %v1442_v8  ;;  %v1433_v13 = vld [vmem:[%s1847_s30 + $0x54] ss:$8 sps:$4 sm:$0xff]   ;;  %v1435_v14 = vld [vmem:[%s1847_s30 + $0x50] ss:$8 sps:$4 sm:$0xff]   ;;  %v1436_v16 = vld [vmem:[%s1847_s30 + $0x64] ss:$8 sps:$4 sm:$0xff]  }
  0x73   : > { %1281 = vmatprep.subr.bf16.mxu1 %v1442_v8  ;;  %1234 = vmatpush3.bf16.msra.mxu0 %v1442_v8  ;;  %v1445_v15 = vld [vmem:[%s1871_s21 + $0x18] sm:$0xff]   ;;  %v1438_v17 = vld [vmem:[%s1847_s30 + $0x60] ss:$8 sps:$4 sm:$0xff]   ;;  %v1448_v22 = vld [vmem:[%s1871_s21 + $0x30] sm:$0xff]  }
  0x74   : > { %1289 = vmatpush3.bf16.msra.mxu1 %v1442_v8  ;;  %1235 = vmatprep.subr.bf16.mxu0 %v1443_v9  ;;  %v1446_v18 = vld [vmem:[%s1871_s21 + $0x20] sm:$0xff]   ;;  %v1439_v19 = vld [vmem:[%s1847_s30 + $0x74] ss:$8 sps:$4 sm:$0xff]   ;;  %v1441_v20 = vld [vmem:[%s1847_s30 + $0x70] ss:$8 sps:$4 sm:$0xff]  }
  0x75   : > { %333 = vxpose.xlu1.c.b16.cont [3/8] %v1424_v4, 128  ;;  %1282 = vmatprep.subr.bf16.mxu1 %v1443_v9  ;;  %v1447_v21 = vld [vmem:[%s1871_s21 + $0x28] sm:$0xff]   ;;  %v1449_v23 = vld [vmem:[%s1871_s21 + $0x38] sm:$0xff]  }
  0x76   : > { %317 = vxpose.xlu0.c.b16.cont [3/8] %v1426_v5, 128 }
  0x77   : > { %1236 = vmatpush3.bf16.msra.mxu0 %v1443_v9 }
  0x78   : > { %1290 = vmatpush3.bf16.msra.mxu1 %v1443_v9  ;;  %1237 = vmatprep.subr.bf16.mxu0 %v1444_v12 }
  0x79   : > { %334 = vxpose.xlu1.c.b16.cont [4/8] %v1427_v6, 128  ;;  %1283 = vmatprep.subr.bf16.mxu1 %v1444_v12 }
  0x7a   : > { %318 = vxpose.xlu0.c.b16.cont [4/8] %v1429_v7, 128 }
  0x7b   : > { %1238 = vmatpush3.bf16.msra.mxu0 %v1444_v12 }
  0x7c   : > { %1291 = vmatpush3.bf16.msra.mxu1 %v1444_v12  ;;  %1239 = vmatprep.subr.bf16.mxu0 %v1445_v15 }
  0x7d   : > { %335 = vxpose.xlu1.c.b16.cont [5/8] %v1430_v10, 128  ;;  %1284 = vmatprep.subr.bf16.mxu1 %v1445_v15 }
  0x7e   : > { %319 = vxpose.xlu0.c.b16.cont [5/8] %v1432_v11, 128 }
  0x7f   : > { %1240 = vmatpush3.bf16.msra.mxu0 %v1445_v15 }
  0x80   : > { %1292 = vmatpush3.bf16.msra.mxu1 %v1445_v15  ;;  %1241 = vmatprep.subr.bf16.mxu0 %v1446_v18 }
  0x81   : > { %336 = vxpose.xlu1.c.b16.cont [6/8] %v1433_v13, 128  ;;  %1285 = vmatprep.subr.bf16.mxu1 %v1446_v18 }
  0x82   : > { %320 = vxpose.xlu0.c.b16.cont [6/8] %v1435_v14, 128 }
  0x83   : > { %1242 = vmatpush3.bf16.msra.mxu0 %v1446_v18 }
  0x84   : > { %1293 = vmatpush3.bf16.msra.mxu1 %v1446_v18  ;;  %1243 = vmatprep.subr.bf16.mxu0 %v1447_v21 }
  0x85   : > { %337 = vxpose.xlu1.c.b16.cont [7/8] %v1436_v16, 128  ;;  %1286 = vmatprep.subr.bf16.mxu1 %v1447_v21 }
  0x86   : > { %321 = vxpose.xlu0.c.b16.cont [7/8] %v1438_v17, 128 }
  0x87   : > { %1244 = vmatpush3.bf16.msra.mxu0 %v1447_v21 }
  0x88   : > { %1294 = vmatpush3.bf16.msra.mxu1 %v1447_v21  ;;  %1245 = vmatprep.subr.bf16.mxu0 %v1448_v22 }
  0x89   : > { %338 = vxpose.xlu1.c.b16.end [8/8] %v1439_v19, 128  ;;  %1287 = vmatprep.subr.bf16.mxu1 %v1448_v22 }
  0x8a   : > { %322 = vxpose.xlu0.c.b16.end [8/8] %v1441_v20, 128 }
  0x8b   : > { %1246 = vmatpush3.bf16.msra.mxu0 %v1448_v22 }
  0x8c   : > { %1295 = vmatpush3.bf16.msra.mxu1 %v1448_v22  ;;  %1247 = vmatprep.subr.bf16.mxu0 %v1449_v23 }
  0x8d   : > { %1288 = vmatprep.subr.bf16.mxu1 %v1449_v23 }
  0x8f   : > { %1248 = vmatpush3.bf16.msra.mxu0 %v1449_v23 }
  0x90   : > { %1296 = vmatpush3.bf16.msra.mxu1 %v1449_v23 }
  0xd3   : > { %v339_v24 = vpop.trf.xlu1 }
  0xd4   : > { %v323_v25 = vpop.trf.xlu0  ;;  %1265 = vmatprep.mubr.bf16.mxu1 %v339_v24 }
  0xd5   : > { %1249 = vmatprep.mubr.bf16.mxu0 %v323_v25 }
  0xd7   : > { %v340_v26 = vpop.trf.xlu1 }
  0xd8   : > { %v324_v27 = vpop.trf.xlu0  ;;  %1266 = vmatmul.mubr.bf16.vlgmr.msra.gmra.mrb[0].mxu1 %v340_v26 }
  0xd9   : > { %1250 = vmatmul.mubr.bf16.vlgmr.msra.gmra.mrb[0].mxu0 %v324_v27 }
  0xdb   : > { %v341_v28 = vpop.trf.xlu1 }
  0xdc   : > { %v325_v29 = vpop.trf.xlu0  ;;  %1269 = vmatprep.mubr.bf16.mxu1 %v341_v28 }
  0xdd   : > { %1253 = vmatprep.mubr.bf16.mxu0 %v325_v29 }
  0xdf   : > { %v342_v30 = vpop.trf.xlu1 }
  0xe0   : > { %v326_v31 = vpop.trf.xlu0  ;;  %1270 = vmatmul.mubr.bf16.gmra.mrb[4].mxu1 %v342_v30 }
  0xe1   : > { %1254 = vmatmul.mubr.bf16.gmra.mrb[4].mxu0 %v326_v31 }
  0xe3   : > { %v343_v32 = vpop.trf.xlu1 }
  0xe4   : > { %v327_v33 = vpop.trf.xlu0  ;;  %1273 = vmatprep.mubr.bf16.mxu1 %v343_v32 }
  0xe5   : > { %1257 = vmatprep.mubr.bf16.mxu0 %v327_v33 }
  0xe7   : > { %v344_v34 = vpop.trf.xlu1 }
  0xe8   : > { %v328_v35 = vpop.trf.xlu0  ;;  %1274 = vmatmul.mubr.bf16.gmra.mrb[8].mxu1 %v344_v34 }
  0xe9   : > { %1258 = vmatmul.mubr.bf16.gmra.mrb[8].mxu0 %v328_v35 }
  0xeb   : > { %v345_v36 = vpop.trf.xlu1 }
  0xec   : > { %v329_v37 = vpop.trf.xlu0  ;;  %1277 = vmatprep.mubr.bf16.mxu1 %v345_v36 }
  0xed   : > { %1261 = vmatprep.mubr.bf16.mxu0 %v329_v37 }
  0xef   : > { %v346_v38 = vpop.trf.xlu1 }
  0xf0   : > { %v330_v39 = vpop.trf.xlu0  ;;  %1278 = vmatmul.mubr.bf16.gmra.mrb[12].mxu1 %v346_v38 }
  0xf1   : > { %1262 = vmatmul.mubr.bf16.gmra.mrb[12].mxu0 %v330_v39 }
 0x1ab   : > { %v1889_v40 = vpop.f32.mrb[0].mxu1 }
 0x1ac   : > { %v1891_v41 = vpop.f32.mrb[0].mxu0  ;;  %v1893_v42 = vpop.f32.mrb[1].mxu1  ;;  %578 = vst [vmem:[#allocation2 + $0x90] sm:$0xff] (!%p1041_p5), %v1889_v40 }
 0x1ad   : > { %v1895_v43 = vpop.f32.mrb[1].mxu0  ;;  %v1897_v44 = vpop.f32.mrb[2].mxu1  ;;  %562 = vst [vmem:[#allocation2 + $0x10] sm:$0xff] (!%p1041_p5), %v1891_v41  ;;  %576 = vst [vmem:[#allocation2 + $0x80] sm:$0xff] (!%p1041_p5), %v1893_v42 }
 0x1ae   : > { %v1899_v45 = vpop.f32.mrb[2].mxu0  ;;  %v1901_v46 = vpop.f32.mrb[3].mxu1  ;;  %560 = vst [vmem:[#allocation2] sm:$0xff] (!%p1041_p5), %v1895_v43  ;;  %579 = vst [vmem:[#allocation2 + $0x98] sm:$0xff] (!%p1041_p5), %v1897_v44 }
 0x1af   : > { %v1903_v47 = vpop.f32.mrb[3].mxu0  ;;  %563 = vst [vmem:[#allocation2 + $0x18] sm:$0xff] (!%p1041_p5), %v1899_v45  ;;  %577 = vst [vmem:[#allocation2 + $0x88] sm:$0xff] (!%p1041_p5), %v1901_v46 }
 0x1b0   : > { %561 = vst [vmem:[#allocation2 + $0x8] sm:$0xff] (!%p1041_p5), %v1903_v47 }
 0x1b3   : > { %v1905_v48 = vpop.f32.mrb[4].mxu1 }
 0x1b4   : > { %v1907_v49 = vpop.f32.mrb[4].mxu0  ;;  %v1909_v50 = vpop.f32.mrb[5].mxu1  ;;  %582 = vst [vmem:[#allocation2 + $0xb0] sm:$0xff] (!%p1041_p5), %v1905_v48 }
 0x1b5   : > { %v1911_v51 = vpop.f32.mrb[5].mxu0  ;;  %v1913_v52 = vpop.f32.mrb[6].mxu1  ;;  %566 = vst [vmem:[#allocation2 + $0x30] sm:$0xff] (!%p1041_p5), %v1907_v49  ;;  %580 = vst [vmem:[#allocation2 + $0xa0] sm:$0xff] (!%p1041_p5), %v1909_v50 }
 0x1b6   : > { %v1915_v53 = vpop.f32.mrb[6].mxu0  ;;  %v1917_v54 = vpop.f32.mrb[7].mxu1  ;;  %564 = vst [vmem:[#allocation2 + $0x20] sm:$0xff] (!%p1041_p5), %v1911_v51  ;;  %583 = vst [vmem:[#allocation2 + $0xb8] sm:$0xff] (!%p1041_p5), %v1913_v52 }
 0x1b7   : > { %v1919_v55 = vpop.f32.mrb[7].mxu0  ;;  %567 = vst [vmem:[#allocation2 + $0x38] sm:$0xff] (!%p1041_p5), %v1915_v53  ;;  %581 = vst [vmem:[#allocation2 + $0xa8] sm:$0xff] (!%p1041_p5), %v1917_v54 }
 0x1b8   : > { %565 = vst [vmem:[#allocation2 + $0x28] sm:$0xff] (!%p1041_p5), %v1919_v55 }
 0x1bb   : > { %v1921_v56 = vpop.f32.mrb[8].mxu1 }
 0x1bc   : > { %v1923_v57 = vpop.f32.mrb[8].mxu0  ;;  %v1925_v58 = vpop.f32.mrb[9].mxu1  ;;  %586 = vst [vmem:[#allocation2 + $0xd0] sm:$0xff] (!%p1041_p5), %v1921_v56 }
 0x1bd   : > { %v1927_v59 = vpop.f32.mrb[9].mxu0  ;;  %v1929_v60 = vpop.f32.mrb[10].mxu1  ;;  %570 = vst [vmem:[#allocation2 + $0x50] sm:$0xff] (!%p1041_p5), %v1923_v57  ;;  %584 = vst [vmem:[#allocation2 + $0xc0] sm:$0xff] (!%p1041_p5), %v1925_v58 }
 0x1be   : > { %v1931_v61 = vpop.f32.mrb[10].mxu0  ;;  %v1933_v62 = vpop.f32.mrb[11].mxu1  ;;  %568 = vst [vmem:[#allocation2 + $0x40] sm:$0xff] (!%p1041_p5), %v1927_v59  ;;  %587 = vst [vmem:[#allocation2 + $0xd8] sm:$0xff] (!%p1041_p5), %v1929_v60 }
 0x1bf   : > { %v1935_v63 = vpop.f32.mrb[11].mxu0  ;;  %571 = vst [vmem:[#allocation2 + $0x58] sm:$0xff] (!%p1041_p5), %v1931_v61  ;;  %585 = vst [vmem:[#allocation2 + $0xc8] sm:$0xff] (!%p1041_p5), %v1933_v62 }
 0x1c0   : > { %569 = vst [vmem:[#allocation2 + $0x48] sm:$0xff] (!%p1041_p5), %v1935_v63 }
 0x1c1   : > { %559 = sbr.rel (%p1041_p5) target bundleno = 457 (0x1c9), region = 40 }
 0x1c3   : > { %v1937_v0 = vpop.f32.mrb[12].mxu1 }
 0x1c4   : > { %v1939_v1 = vpop.f32.mrb[12].mxu0  ;;  %v1941_v2 = vpop.f32.mrb[13].mxu1  ;;  %590 = vst [vmem:[#allocation2 + $0xf0] sm:$0xff] (!%p1041_p5), %v1937_v0 }
 0x1c5   : > { %v1943_v3 = vpop.f32.mrb[13].mxu0  ;;  %v1945_v4 = vpop.f32.mrb[14].mxu1  ;;  %574 = vst [vmem:[#allocation2 + $0x70] sm:$0xff] (!%p1041_p5), %v1939_v1  ;;  %588 = vst [vmem:[#allocation2 + $0xe0] sm:$0xff] (!%p1041_p5), %v1941_v2 }
 0x1c6   : > { %v1947_v5 = vpop.f32.mrb[14].mxu0  ;;  %v1949_v6 = vpop.f32.mrb[15].mxu1  ;;  %572 = vst [vmem:[#allocation2 + $0x60] sm:$0xff] (!%p1041_p5), %v1943_v3  ;;  %591 = vst [vmem:[#allocation2 + $0xf8] sm:$0xff] (!%p1041_p5), %v1945_v4 }
 0x1c7   : > { %v1951_v7 = vpop.f32.mrb[15].mxu0  ;;  %575 = vst [vmem:[#allocation2 + $0x78] sm:$0xff] (!%p1041_p5), %v1947_v5  ;;  %589 = vst [vmem:[#allocation2 + $0xe8] sm:$0xff] (!%p1041_p5), %v1949_v6 }
 0x1c8   : > { %573 = vst [vmem:[#allocation2 + $0x68] sm:$0xff] %v1951_v7 }
 0x1c9 PF: > { %p1042_p4 = scmp.eq.s32.totalorder %s1618_s15, 0 }
 0x1ca   : > { %v596_v8 = vld [vmem:[#allocation2] sm:$0xff] (!%p1042_p4)  ;;  %v597_v9 = vld [vmem:[#allocation2 + $0x8] sm:$0xff] (!%p1042_p4)  ;;  %v598_v10 = vld [vmem:[#allocation2 + $0x10] sm:$0xff] (!%p1042_p4) }
 0x1cb   : > { %595 = sbr.rel (%p1042_p4) target bundleno = 477 (0x1dd), region = 44  ;;  %v628_v11 = vadd.f32 (!%p1042_p4), %v596_v8, %v1895_v43  ;;  %v629_v12 = vadd.f32 (!%p1042_p4), %v597_v9, %v1903_v47  ;;  %v630_v13 = vadd.f32 (!%p1042_p4), %v1891_v41, %v598_v10  ;;  %v599_v14 = vld [vmem:[#allocation2 + $0x18] sm:$0xff] (!%p1042_p4)  ;;  %v600_v15 = vld [vmem:[#allocation2 + $0x20] sm:$0xff] (!%p1042_p4)  ;;  %v601_v16 = vld [vmem:[#allocation2 + $0x28] sm:$0xff] (!%p1042_p4) }
 0x1cc   : > { %v631_v17 = vadd.f32 (!%p1042_p4), %v1899_v45, %v599_v14  ;;  %v632_v18 = vadd.f32 (!%p1042_p4), %v600_v15, %v1911_v51  ;;  %v633_v19 = vadd.f32 (!%p1042_p4), %v601_v16, %v1919_v55  ;;  %v602_v20 = vld [vmem:[#allocation2 + $0x30] sm:$0xff] (!%p1042_p4)  ;;  %v603_v21 = vld [vmem:[#allocation2 + $0x38] sm:$0xff] (!%p1042_p4)  ;;  %v604_v22 = vld [vmem:[#allocation2 + $0x40] sm:$0xff] (!%p1042_p4) }
 0x1cd   : > { %660 = vst [vmem:[#allocation2] sm:$0xff] (!%p1042_p4), %v628_v11  ;;  %661 = vst [vmem:[#allocation2 + $0x8] sm:$0xff] (!%p1042_p4), %v629_v12  ;;  %v634_v23 = vadd.f32 (!%p1042_p4), %v1907_v49, %v602_v20  ;;  %v635_v24 = vadd.f32 (!%p1042_p4), %v1915_v53, %v603_v21  ;;  %v636_v25 = vadd.f32 (!%p1042_p4), %v604_v22, %v1927_v59  ;;  %v605_v26 = vld [vmem:[#allocation2 + $0x48] sm:$0xff] (!%p1042_p4)  ;;  %v606_v27 = vld [vmem:[#allocation2 + $0x50] sm:$0xff] (!%p1042_p4) }
 0x1ce   : > { %662 = vst [vmem:[#allocation2 + $0x10] sm:$0xff] (!%p1042_p4), %v630_v13  ;;  %v607_v28 = vld [vmem:[#allocation2 + $0x58] sm:$0xff] (!%p1042_p4)  ;;  %663 = vst [vmem:[#allocation2 + $0x18] sm:$0xff] (!%p1042_p4), %v631_v17  ;;  %v637_v29 = vadd.f32 (!%p1042_p4), %v605_v26, %v1935_v63  ;;  %v638_v30 = vadd.f32 (!%p1042_p4), %v1923_v57, %v606_v27  ;;  %v608_v32 = vld [vmem:[#allocation2 + $0x60] sm:$0xff] (!%p1042_p4) }
 0x1cf   : > { %664 = vst [vmem:[#allocation2 + $0x20] sm:$0xff] (!%p1042_p4), %v632_v18  ;;  %665 = vst [vmem:[#allocation2 + $0x28] sm:$0xff] (!%p1042_p4), %v633_v19  ;;  %v639_v31 = vadd.f32 (!%p1042_p4), %v1931_v61, %v607_v28  ;;  %v609_v33 = vld [vmem:[#allocation2 + $0x68] sm:$0xff] (!%p1042_p4)  ;;  %v610_v34 = vld [vmem:[#allocation2 + $0x70] sm:$0xff] (!%p1042_p4)  ;;  %v640_v35 = vadd.f32 (!%p1042_p4), %v608_v32, %v1943_v3 }
 0x1d0   : > { %666 = vst [vmem:[#allocation2 + $0x30] sm:$0xff] (!%p1042_p4), %v634_v23  ;;  %667 = vst [vmem:[#allocation2 + $0x38] sm:$0xff] (!%p1042_p4), %v635_v24  ;;  %v641_v36 = vadd.f32 (!%p1042_p4), %v609_v33, %v1951_v7  ;;  %v642_v37 = vadd.f32 (!%p1042_p4), %v1939_v1, %v610_v34  ;;  %v611_v38 = vld [vmem:[#allocation2 + $0x78] sm:$0xff] (!%p1042_p4)  ;;  %v612_v39 = vld [vmem:[#allocation2 + $0x80] sm:$0xff] (!%p1042_p4) }
 0x1d1   : > { %668 = vst [vmem:[#allocation2 + $0x40] sm:$0xff] (!%p1042_p4), %v636_v25  ;;  %v613_v41 = vld [vmem:[#allocation2 + $0x88] sm:$0xff] (!%p1042_p4)  ;;  %669 = vst [vmem:[#allocation2 + $0x48] sm:$0xff] (!%p1042_p4), %v637_v29  ;;  %v643_v43 = vadd.f32 (!%p1042_p4), %v1947_v5, %v611_v38  ;;  %v644_v45 = vadd.f32 (!%p1042_p4), %v612_v39, %v1893_v42  ;;  %v614_v49 = vld [vmem:[#allocation2 + $0x90] sm:$0xff] (!%p1042_p4) }
 0x1d2   : > { %670 = vst [vmem:[#allocation2 + $0x50] sm:$0xff] %v638_v30  ;;  %671 = vst [vmem:[#allocation2 + $0x58] sm:$0xff] %v639_v31  ;;  %v645_v47 = vadd.f32 %v613_v41, %v1901_v46  ;;  %v615_v51 = vld [vmem:[#allocation2 + $0x98] sm:$0xff]  ;;  %v616_v53 = vld [vmem:[#allocation2 + $0xa0] sm:$0xff]  ;;  %v646_v55 = vadd.f32 %v1889_v40, %v614_v49 }
 0x1d3   : > { %672 = vst [vmem:[#allocation2 + $0x60] sm:$0xff] %v640_v35  ;;  %673 = vst [vmem:[#allocation2 + $0x68] sm:$0xff] %v641_v36  ;;  %v647_v57 = vadd.f32 %v1897_v44, %v615_v51  ;;  %v648_v59 = vadd.f32 %v616_v53, %v1909_v50  ;;  %v617_v61 = vld [vmem:[#allocation2 + $0xa8] sm:$0xff]  ;;  %v618_v63 = vld [vmem:[#allocation2 + $0xb0] sm:$0xff] }
 0x1d4   : > { %674 = vst [vmem:[#allocation2 + $0x70] sm:$0xff] %v642_v37  ;;  %v619_v1 = vld [vmem:[#allocation2 + $0xb8] sm:$0xff]  ;;  %675 = vst [vmem:[#allocation2 + $0x78] sm:$0xff] %v643_v43  ;;  %v649_v42 = vadd.f32 %v617_v61, %v1917_v54  ;;  %v650_v46 = vadd.f32 %v1905_v48, %v618_v63  ;;  %v620_v5 = vld [vmem:[#allocation2 + $0xc0] sm:$0xff] }
 0x1d5   : > { %676 = vst [vmem:[#allocation2 + $0x80] sm:$0xff] %v644_v45  ;;  %677 = vst [vmem:[#allocation2 + $0x88] sm:$0xff] %v645_v47  ;;  %v651_v3 = vadd.f32 %v1913_v52, %v619_v1  ;;  %v621_v7 = vld [vmem:[#allocation2 + $0xc8] sm:$0xff]  ;;  %v622_v8 = vld [vmem:[#allocation2 + $0xd0] sm:$0xff]  ;;  %v652_v40 = vadd.f32 %v620_v5, %v1925_v58 }
 0x1d6   : > { %678 = vst [vmem:[#allocation2 + $0x90] sm:$0xff] %v646_v55  ;;  %679 = vst [vmem:[#allocation2 + $0x98] sm:$0xff] %v647_v57  ;;  %v653_v44 = vadd.f32 %v621_v7, %v1933_v62  ;;  %v654_v50 = vadd.f32 %v1921_v56, %v622_v8  ;;  %v623_v9 = vld [vmem:[#allocation2 + $0xd8] sm:$0xff]  ;;  %v624_v10 = vld [vmem:[#allocation2 + $0xe0] sm:$0xff] }
 0x1d7   : > { %680 = vst [vmem:[#allocation2 + $0xa0] sm:$0xff] %v648_v59  ;;  %v625_v11 = vld [vmem:[#allocation2 + $0xe8] sm:$0xff]  ;;  %681 = vst [vmem:[#allocation2 + $0xa8] sm:$0xff] %v649_v42  ;;  %v655_v48 = vadd.f32 %v1929_v60, %v623_v9  ;;  %v656_v52 = vadd.f32 %v624_v10, %v1941_v2  ;;  %v626_v12 = vld [vmem:[#allocation2 + $0xf0] sm:$0xff] }
 0x1d8   : > { %682 = vst [vmem:[#allocation2 + $0xb0] sm:$0xff] %v650_v46  ;;  %683 = vst [vmem:[#allocation2 + $0xb8] sm:$0xff] %v651_v3  ;;  %v657_v54 = vadd.f32 %v625_v11, %v1949_v6  ;;  %v627_v13 = vld [vmem:[#allocation2 + $0xf8] sm:$0xff]  ;;  %v658_v58 = vadd.f32 %v1937_v0, %v626_v12 }
 0x1d9   : > { %684 = vst [vmem:[#allocation2 + $0xc0] sm:$0xff] %v652_v40  ;;  %685 = vst [vmem:[#allocation2 + $0xc8] sm:$0xff] %v653_v44  ;;  %v659_v56 = vadd.f32 %v1945_v4, %v627_v13 }
 0x1da   : > { %686 = vst [vmem:[#allocation2 + $0xd0] sm:$0xff] %v654_v50  ;;  %687 = vst [vmem:[#allocation2 + $0xd8] sm:$0xff] %v655_v48 }
 0x1db   : > { %688 = vst [vmem:[#allocation2 + $0xe0] sm:$0xff] %v656_v52  ;;  %689 = vst [vmem:[#allocation2 + $0xe8] sm:$0xff] %v657_v54 }
 0x1dc   : > { %690 = vst [vmem:[#allocation2 + $0xf0] sm:$0xff] %v658_v58  ;;  %691 = vst [vmem:[#allocation2 + $0xf8] sm:$0xff] %v659_v56 }
 0x1dd PF: > { %p1043_p2 = scmp.ne.s32.totalorder %s1618_s15, 5 }
 0x1de   : > { %v708_v26 = vld [vmem:[#allocation2 + $0x60] sm:$0xff] (!%p1043_p2)  ;;  %v709_v27 = vld [vmem:[#allocation2 + $0x68] sm:$0xff] (!%p1043_p2)  ;;  %v710_v28 = vld [vmem:[#allocation2 + $0x70] sm:$0xff] (!%p1043_p2) }
 0x1df   : > { %695 = sbr.rel (%p1043_p2) target bundleno = 493 (0x1ed), region = 48  ;;  %v696_v60 = vld [vmem:[#allocation2] sm:$0xff] (!%p1043_p2)  ;;  %v697_v62 = vld [vmem:[#allocation2 + $0x8] sm:$0xff] (!%p1043_p2)  ;;  %v1147_v29 = vpack.c.bf16 (!%p1043_p2), %v709_v27, %v708_v26  ;;  %v711_v30 = vld [vmem:[#allocation2 + $0x78] sm:$0xff] (!%p1043_p2) }
 0x1e0   : > { %v698_v2 = vld [vmem:[#allocation2 + $0x10] sm:$0xff] (!%p1043_p2)  ;;  %v1117_v6 = vpack.c.bf16 (!%p1043_p2), %v697_v62, %v696_v60  ;;  %v699_v14 = vld [vmem:[#allocation2 + $0x18] sm:$0xff] (!%p1043_p2)  ;;  %v712_v31 = vld [vmem:[#allocation2 + $0x80] sm:$0xff] (!%p1043_p2)  ;;  %v1152_v33 = vpack.c.bf16 (!%p1043_p2), %v711_v30, %v710_v28 }
 0x1e1   : > { %v700_v0 = vld [vmem:[#allocation2 + $0x20] sm:$0xff] (!%p1043_p2)  ;;  %v701_v15 = vld [vmem:[#allocation2 + $0x28] sm:$0xff] (!%p1043_p2)  ;;  %v1122_v4 = vpack.c.bf16 (!%p1043_p2), %v699_v14, %v698_v2  ;;  %v714_v35 = vld [vmem:[#allocation2 + $0x90] sm:$0xff] (!%p1043_p2)  ;;  %1199 = vst [vmem:[%s1954_s3 + $0x30] sm:$0xff] (!%p1043_p2), %v1147_v29  }
 0x1e2   : > { %v1127_v16 = vpack.c.bf16 (!%p1043_p2), %v701_v15, %v700_v0  ;;  %v702_v17 = vld [vmem:[#allocation2 + $0x30] sm:$0xff] (!%p1043_p2)  ;;  %v703_v18 = vld [vmem:[#allocation2 + $0x38] sm:$0xff] (!%p1043_p2)  ;;  %1118 = vst [vmem:[%s1954_s3] sm:$0xff] (!%p1043_p2), %v1117_v6   ;;  %v713_v32 = vld [vmem:[#allocation2 + $0x88] sm:$0xff] (!%p1043_p2) }
 0x1e3   : > { %v704_v19 = vld [vmem:[#allocation2 + $0x40] sm:$0xff] (!%p1043_p2)  ;;  %v1132_v20 = vpack.c.bf16 (!%p1043_p2), %v703_v18, %v702_v17  ;;  %v705_v21 = vld [vmem:[#allocation2 + $0x48] sm:$0xff] (!%p1043_p2)  ;;  %1194 = vst [vmem:[%s1954_s3 + $0x8] sm:$0xff] (!%p1043_p2), %v1122_v4   ;;  %v1157_v34 = vpack.c.bf16 (!%p1043_p2), %v713_v32, %v712_v31  ;;  %v715_v36 = vld [vmem:[#allocation2 + $0x98] sm:$0xff] (!%p1043_p2) }
 0x1e4   : > { %v706_v22 = vld [vmem:[#allocation2 + $0x50] sm:$0xff] (!%p1043_p2)  ;;  %v707_v23 = vld [vmem:[#allocation2 + $0x58] sm:$0xff] (!%p1043_p2)  ;;  %1195 = vst [vmem:[%s1954_s3 + $0x10] sm:$0xff] (!%p1043_p2), %v1127_v16   ;;  %v1137_v24 = vpack.c.bf16 (!%p1043_p2), %v705_v21, %v704_v19  ;;  %v716_v37 = vld [vmem:[#allocation2 + $0xa0] sm:$0xff] (!%p1043_p2)  ;;  %v1162_v38 = vpack.c.bf16 (!%p1043_p2), %v715_v36, %v714_v35 }
 0x1e5   : > { %v1142_v25 = vpack.c.bf16 (!%p1043_p2), %v707_v23, %v706_v22  ;;  %1196 = vst [vmem:[%s1954_s3 + $0x18] sm:$0xff] (!%p1043_p2), %v1132_v20   ;;  %v717_v39 = vld [vmem:[#allocation2 + $0xa8] sm:$0xff] (!%p1043_p2)  ;;  %v718_v41 = vld [vmem:[#allocation2 + $0xb0] sm:$0xff] (!%p1043_p2)  ;;  %v719_v43 = vld [vmem:[#allocation2 + $0xb8] sm:$0xff] (!%p1043_p2) }
 0x1e6   : > { %1197 = vst [vmem:[%s1954_s3 + $0x20] sm:$0xff] %v1137_v24   ;;  %1200 = vst [vmem:[%s1954_s3 + $0x38] sm:$0xff] %v1152_v33   ;;  %v1167_v45 = vpack.c.bf16 %v717_v39, %v716_v37  ;;  %v1172_v47 = vpack.c.bf16 %v719_v43, %v718_v41  ;;  %v720_v49 = vld [vmem:[#allocation2 + $0xc0] sm:$0xff]  ;;  %v721_v51 = vld [vmem:[#allocation2 + $0xc8] sm:$0xff] }
 0x1e7   : > { %1198 = vst [vmem:[%s1954_s3 + $0x28] sm:$0xff] %v1142_v25   ;;  %1201 = vst [vmem:[%s1954_s3 + $0x40] sm:$0xff] %v1157_v34   ;;  %v722_v53 = vld [vmem:[#allocation2 + $0xd0] sm:$0xff]  ;;  %v1177_v55 = vpack.c.bf16 %v721_v51, %v720_v49  ;;  %v723_v57 = vld [vmem:[#allocation2 + $0xd8] sm:$0xff] }
 0x1e8   : > { %1202 = vst [vmem:[%s1954_s3 + $0x48] sm:$0xff] %v1162_v38   ;;  %v724_v59 = vld [vmem:[#allocation2 + $0xe0] sm:$0xff]  ;;  %v725_v61 = vld [vmem:[#allocation2 + $0xe8] sm:$0xff]  ;;  %1203 = vst [vmem:[%s1954_s3 + $0x50] sm:$0xff] %v1167_v45   ;;  %v1182_v63 = vpack.c.bf16 %v723_v57, %v722_v53 }
 0x1e9   : > { %1204 = vst [vmem:[%s1954_s3 + $0x58] sm:$0xff] %v1172_v47   ;;  %v1187_v1 = vpack.c.bf16 %v725_v61, %v724_v59  ;;  %v726_v42 = vld [vmem:[#allocation2 + $0xf0] sm:$0xff]  ;;  %v727_v46 = vld [vmem:[#allocation2 + $0xf8] sm:$0xff]  ;;  %1205 = vst [vmem:[%s1954_s3 + $0x60] sm:$0xff] %v1177_v55  }
 0x1ea   : > { %v1192_v3 = vpack.c.bf16 %v727_v46, %v726_v42  ;;  %1206 = vst [vmem:[%s1954_s3 + $0x68] sm:$0xff] %v1182_v63  }
 0x1eb   : > { %1207 = vst [vmem:[%s1954_s3 + $0x70] sm:$0xff] %v1187_v1  }
 0x1ec   : > { %1208 = vst [vmem:[%s1954_s3 + $0x78] sm:$0xff] %v1192_v3  }
 0x1ed PF: > { %s1113_s15 = sshll.u32 %s1622_s16, 11  ;;  %s902_s22 = sshll.u32 %s1954_s3, 4  ;;  %s2046_s22 = int_to_ptr.vmem [resolvable:$true] %s902_s22 }
 0x1ee   : > { %s2043_s24 = scalar_lea.hbm %s2113_s2, %s1113_s15  ;;  %s2050_s1 = scalar_lea.sflag [#allocation5], %s191_s9 }
 0x1ef   : > { %s1508_s28 = scalar_lea.vmem %s2046_s22, 2048  ;;  %p2144_p6 = scmp.ne.s32.totalorder %s2129_s27, 0 }
 0x1f0   : > { %p1509_p3 = scmp.ne.s32.totalorder %s2046_s22, %s1508_s28  ;;  %s1643_s16 = smov [#allocation8]  }
 0x1f1   : > { %s1512_s20 = sshll.u32 %s1643_s16, 4  ;;  %s1513_s20 = int_to_ptr.vmem [resolvable:$false] %s1512_s20 }
 0x1f2   : > { %p1510_p10 = pnand %p1509_p3, %p2144_p6  ;;  %s1514_s6 = scalar_lea.vmem %s1513_s20, 4096 }
 0x1f3   : > { %p1515_p0 = scmp.lt.s32.totalorder %s2046_s22, %s1513_s20  ;;  %p1516_p8 = scmp.lt.s32.totalorder %s1514_s6, %s1508_s28 }
 0x1f4   : > { %p1511_p12 = pneg %p1510_p10 }
 0x1f5   : > { %p1517_p11 = por %p1516_p8, %p1515_p0 }
 0x1f7   : > { %p1518_p13 = pnand %p1517_p11, %p1511_p12 }
 0x1f9   : > { %1521 = shalt.err (!%p1518_p13)
}
 0x1fa   : > { %s1522_s7 = scalar_lea.hbm %s2043_s24, 2048  ;;  %s1526_s26 = scalar_lea.hbm %s2113_s2, 6144 }
 0x1fb   : > { %p1523_p7 = scmp.ne.s32.totalorder %s2043_s24, %s1522_s7  ;;  %p1527_p5 = scmp.lt.u32.totalorder %s2043_s24, %s2113_s2 }
 0x1fc   : > { %p1528_p4 = scmp.lt.u32.totalorder %s1526_s26, %s1522_s7  ;;  %p1530_p3 = scmp.lt.u32.totalorder %s1522_s7, %s2043_s24 }
 0x1fd   : > { %p1524_p9 = pnand %p1523_p7, %p2144_p6 }
 0x1fe   : > { %p1529_p2 = por %p1528_p4, %p1527_p5 }
 0x1ff   : > { %p1525_p1 = pneg %p1524_p9 }
 0x200   : > { %p1531_p10 = por %p1530_p3, %p1529_p2 }
 0x202   : > { %p1532_p12 = pnand %p1531_p10, %p1525_p1 }
 0x204   : > { %1535 = shalt.err (!%p1532_p12)
}
 0x205   : > { %s1644_s5 = smov 64   ;;  %s1645_s21 = smov 4  }
 0x206   : > { %1304 = dma.vmem_to_hbm [thread:$0]  (%p2144_p6), %s2046_s22, 2048, %s2043_s24, %s2050_s1, %s1644_s5, %s1644_s5, %s1645_s21  }
 0x207 PF: > { %s2145_s3 = sld [smem:[#allocation12_spill]]  ;;  %s2146_s15 = sld [smem:[#allocation13_spill]] }
 0x208   : > { %p1321_p0 = scmp.ge.s32.totalorder %s1634_s19, 2 }
 0x20d   : > { %s917_s12 = sand.u32 1, %s2145_s3   ;;  %p2147_p8 = scmp.ne.s32.totalorder %s2146_s15, 0 }
 0x20e   : > { %s918_s25 = scalar_lea.sflag [#allocation5], %s917_s12 }
 0x20f   : > { %p1315_p11 = pnand %p1321_p0, %p2147_p8 }
 0x211   : > { %1589 = dma.done.wait (!%p1315_p11), %s918_s25, 2048  }
 0x212   : > { %1591 = vsyncadd (!%p1315_p11), %s918_s25, 4294965248  ;;  %s19_s19 = sadd.s32 1, %s1634_s19   ;;  %s2148_s27 = sld [smem:[#allocation14_spill]] }
 0x213   : > { %p16_p13 = scmp.ge.s32.totalorder %s19_s19, 20   ;;  %s2149_s24 = sld [smem:[#allocation15_spill]] }
 0x214   : > { %s2150_s9 = smov %s1598_s10  ;;  %s2151_s10 = smov %s1602_s11 }
 0x215   : > { %s2152_s11 = smov %s1809_s8  ;;  %s2153_s12 = smov %s1610_s13 }
 0x216   : > { %s2154_s13 = smov %s1614_s14  ;;  %s2155_s14 = smov %s1814_s4 }
 0x217   : > { %s2156_s15 = smov %s1626_s17  ;;  %s2157_s16 = smov %s1630_s18 }
 0x218   : > { %s2158_s17 = smov %s2148_s27  ;;  %18 = sbr.rel (!%p16_p13) target bundleno = 12 (0xc), region = 90 }
 0x219   : > { %s2159_s18 = smov %s2149_s24 }
 0x21f   :  { %923 = vsyncpa [#allocation4], 1 }
 0x220   :  { %925 = vsyncpa [#allocation4 + $0x1], 1 }
 0x221   :  { %926 = vsyncpa [#allocation7], 1 }
 0x222   :  { %927 = vsyncpa [#allocation5], 1 }
 0x223   :  { %929 = vsyncpa [#allocation5 + $0x1], 1 }

</bundles_post_ra>
